<compile_context>
chip_gen: v7x
topology: tpu7x:2x2x1
jax: 0.10.0
libtpu: 0.0.40
codegen_flags: <defaults>
</compile_context>

<pallas_src>
import jax
import jax.numpy as jnp
import numpy as np
from jax.experimental import pallas as pl
from jax.experimental.pallas import tpu as pltpu


# ----------------------------------------------------------------------------
# Pallas kernel: per grid step (one head h):
#   emb_p = relu(emb @ We_T[h])                  (B, M)
#   key_p = relu(patches[h] @ Wk_T[h])           (N_max, M)
#   out[h] = emb_p @ Wo_e[h] + key_p @ Wo_k[h]   broadcast over (B, N_max, K_pad)
# which equals relu(cat([proj_emb(emb), proj_key(patches)])) @ Wo^T with Wo
# split column-wise (dropout is identity in eval mode), zero-padded to 128
# output lanes.
# ----------------------------------------------------------------------------
def _multihead_kernel(emb_ref, pat_ref, we_ref, wk_ref, woe_ref, wok_ref, out_ref):
    # emb_ref: (B, E)      pat_ref: (N_max, K_in)
    # we_ref:  (E, M)      wk_ref:  (K_in, M)
    # woe_ref: (M, K_pad)  wok_ref: (M, K_pad)   out_ref: (B, N_max, K_pad)
    emb_p = jnp.maximum(
        jnp.dot(emb_ref[...], we_ref[...], preferred_element_type=jnp.float32), 0.0
    )  # (B, M)
    key_p = jnp.maximum(
        jnp.dot(pat_ref[...], wk_ref[...], preferred_element_type=jnp.float32), 0.0
    )  # (N_max, M)
    out_e = jnp.dot(emb_p, woe_ref[...], preferred_element_type=jnp.float32)  # (B, K_pad)
    out_k = jnp.dot(key_p, wok_ref[...], preferred_element_type=jnp.float32)  # (N_max, K_pad)
    # Lane-dense (K_pad = 128) epilogue: unmasked full-lane stores.
    out_ref[...] = (out_e[:, None, :] + out_k[None, :, :]).astype(out_ref.dtype)


def _multihead_pallas(emb2d, patches, we_t, wk_t, wo_e, wo_k):
    # emb2d:   (B, E)
    # patches: (H, N_max, K_in)
    # we_t:    (H, E, M)     wk_t: (H, K_in, M)
    # wo_e:    (H, M, K_pad) wo_k: (H, M, K_pad)   (K_pad = 128, lane-dense)
    B, E = emb2d.shape
    H, N_max, K_in = patches.shape
    M = we_t.shape[-1]
    K_pad = wo_e.shape[-1]

    flops = 2 * H * (B * E * M + N_max * K_in * M + B * M * K_pad + N_max * M * K_pad)
    bytes_accessed = 4 * (
        B * E
        + H * N_max * K_in
        + H * E * M
        + H * K_in * M
        + 2 * H * M * K_pad
        + H * B * N_max * K_pad
    )

    return pl.pallas_call(
        _multihead_kernel,
        out_shape=jax.ShapeDtypeStruct((H, B, N_max, K_pad), jnp.float32),
        grid_spec=pltpu.PrefetchScalarGridSpec(
            num_scalar_prefetch=0,
            grid=(H,),
            in_specs=[
                pl.BlockSpec((B, E), lambda h: (0, 0)),             # emb shared
                pl.BlockSpec((None, N_max, K_in), lambda h: (h, 0, 0)),
                pl.BlockSpec((None, E, M), lambda h: (h, 0, 0)),
                pl.BlockSpec((None, K_in, M), lambda h: (h, 0, 0)),
                pl.BlockSpec((None, M, K_pad), lambda h: (h, 0, 0)),
                pl.BlockSpec((None, M, K_pad), lambda h: (h, 0, 0)),
            ],
            out_specs=pl.BlockSpec((None, B, N_max, K_pad), lambda h: (h, 0, 0, 0)),
        ),
        compiler_params=pltpu.CompilerParams(
            dimension_semantics=("parallel",),   # 2-TC split on v7x
        ),
        cost_estimate=pl.CostEstimate(
            flops=int(flops), transcendentals=0, bytes_accessed=int(bytes_accessed)
        ),
    )(emb2d, patches, we_t, wk_t, wo_e, wo_k)


# ----------------------------------------------------------------------------
# One-time parameter preparation (hoisted transposes / split / lane padding).
# ----------------------------------------------------------------------------
def prepare_multihead_params(heads_params, p_sz, k_pad=128):
    k_out = 3 * p_sz ** 2
    mid = heads_params[0]["We"].shape[0]
    we_t = jnp.stack([p["We"].T for p in heads_params])           # (H, E, M)
    wk_t = jnp.stack([p["Wk"].T for p in heads_params])           # (H, K_in, M)
    wo_e = jnp.stack([p["Wo"][:, :mid].T for p in heads_params])  # (H, M, K_out) emb half
    wo_k = jnp.stack([p["Wo"][:, mid:].T for p in heads_params])  # (H, M, K_out) key half
    pad = k_pad - k_out
    wo_e = jnp.pad(wo_e, ((0, 0), (0, 0), (0, pad)))
    wo_k = jnp.pad(wo_k, ((0, 0), (0, 0), (0, pad)))
    return {"We_T": we_t, "Wk_T": wk_t, "Wo_e": wo_e, "Wo_k": wo_k, "k_out": k_out}


# ----------------------------------------------------------------------------
# MultiHead forward (PyTorch semantics).  Resize / patch (un)rearrange are
# layout glue in plain JAX; all heads' matmuls run in ONE Pallas call.
# ----------------------------------------------------------------------------
def multihead_forward(emb, mean, prepared, p_sz, sizes):
    assert mean.shape[0] == 1, "mean batch is broadcast against the embedding batch"
    emb2d = emb[:, 0, :]                       # (B, E)
    B = emb2d.shape[0]
    k_in = 3 * p_sz ** 2
    k_out = prepared["k_out"]
    n_max = max(sz * sz for sz in sizes)

    # Per-head bilinear resize + patch extraction, stacked with N padded to n_max.
    patches_list = []
    for sz in sizes:
        tgt = p_sz * sz
        # F.interpolate(mean, p_sz*sz, mode='bilinear', align_corners=False)
        o = jax.image.resize(
            mean,
            (mean.shape[0], mean.shape[1], tgt, tgt),
            method="bilinear",
            antialias=False,
        )
        u = v = sz
        # rearrange 'b c (u m) (v n) -> b (u v) (c m n)'  (b == 1)
        p = o.reshape(1, 3, u, p_sz, v, p_sz).transpose(0, 2, 4, 1, 3, 5)
        p = p.reshape(u * v, k_in)
        n = u * v
        if n < n_max:
            p = jnp.pad(p, ((0, n_max - n), (0, 0)))
        patches_list.append(p)
    patches = jnp.stack(patches_list)          # (H, n_max, k_in)

    out = _multihead_pallas(
        emb2d, patches,
        prepared["We_T"], prepared["Wk_T"], prepared["Wo_e"], prepared["Wo_k"],
    )                                          # (H, B, n_max, 128)

    layers = [mean]
    for i, sz in enumerate(sizes):
        n = sz * sz
        y = out[i, :, :n, :k_out]              # slice N / lane padding -> (B, n, k_out)
        # rearrange 'b (u v) (c m n) -> b c (u m) (v n)'  with c = 3
        y = y.reshape(B, sz, sz, 3, p_sz, p_sz).transpose(0, 3, 1, 4, 2, 5)
        y = y.reshape(B, 3, sz * p_sz, sz * p_sz)
        layers.append(y)
    # TODO(synk): U.join semantics are not provided in the source; returning the
    # list of per-scale outputs (mean + one tensor per head) instead.
    return tuple(layers)


# ----------------------------------------------------------------------------
# Deterministic parameter init (matches nn.Linear shapes, bias=False).
# ----------------------------------------------------------------------------
def init_head_params(key, p_sz, e_sz, mid_sz):
    k_in = 3 * p_sz ** 2
    k1, k2, k3 = jax.random.split(key, 3)

    def lin(k, out_f, in_f):
        bound = 1.0 / jnp.sqrt(in_f)
        return jax.random.uniform(k, (out_f, in_f), jnp.float32, -bound, bound)

    return {
        "We": lin(k1, mid_sz, e_sz),        # proj_emb.weight
        "Wk": lin(k2, mid_sz, k_in),        # proj_key.weight
        "Wo": lin(k3, k_in, 2 * mid_sz),    # net[-1].weight
    }


# ----------------------------------------------------------------------------
# Pure-JAX reference (mirrors the torch module, eval mode) for validation.
# ----------------------------------------------------------------------------
def _head_forward_ref(x, emb, params, p_sz):
    b, c, Hh, Ww = x.shape
    u, v = Hh // p_sz, Ww // p_sz
    y = x.reshape(b, c, u, p_sz, v, p_sz).transpose(0, 2, 4, 1, 3, 5)
    y = y.reshape(b, u * v, c * p_sz * p_sz)
    e = emb @ params["We"].T                               # (B, 1, M)
    y = y @ params["Wk"].T                                 # (1, N, M)
    B, N = emb.shape[0], u * v
    e = jnp.broadcast_to(e, (B, N, e.shape[-1]))
    y = jnp.broadcast_to(y, (B, N, y.shape[-1]))
    y = jnp.maximum(jnp.concatenate([e, y], axis=-1), 0.0)
    y = y @ params["Wo"].T                                 # (B, N, 3*p^2)
    y = y.reshape(B, u, v, 3, p_sz, p_sz).transpose(0, 3, 1, 4, 2, 5)
    return y.reshape(B, 3, u * p_sz, v * p_sz)


def multihead_forward_ref(emb, mean, heads_params, p_sz, sizes):
    layers = [mean]
    for params, sz in zip(heads_params, sizes):
        tgt = p_sz * sz
        o = jax.image.resize(
            mean, (mean.shape[0], mean.shape[1], tgt, tgt),
            method="bilinear", antialias=False)
        layers.append(_head_forward_ref(o, emb, params, p_sz))
    return tuple(layers)


if __name__ == "__main__":
    p_sz = 4
    e_sz = 32
    mid_sz = 32
    sizes = (2, 4)          # head output spatial sizes: 8x8 and 16x16

    key = jax.random.PRNGKey(0)
    k_emb, k_mean, k_h = jax.random.split(key, 3)

    B = 2
    emb = jax.random.normal(k_emb, (B, 1, e_sz), jnp.float32)      # (B, 1, E)
    mean = jax.random.normal(k_mean, (1, 3, 16, 16), jnp.float32)  # NCHW

    head_keys = jax.random.split(k_h, len(sizes))
    heads_params = [init_head_params(hk, p_sz, e_sz, mid_sz) for hk in head_keys]
    prepared = prepare_multihead_params(heads_params, p_sz)        # hoisted, once

    outs = multihead_forward(emb, mean, prepared, p_sz, sizes)
    for o in outs:
        jax.block_until_ready(o)

    # shape sanity implied by the torch module
    assert outs[0].shape == (1, 3, 16, 16)
    assert outs[1].shape == (B, 3, 8, 8)
    assert outs[2].shape == (B, 3, 16, 16)

    # numerical sanity vs pure-JAX reference
    refs = multihead_forward_ref(emb, mean, heads_params, p_sz, sizes)
    for o, r in zip(outs, refs):
        np.testing.assert_allclose(np.asarray(o), np.asarray(r), rtol=5e-2, atol=5e-2)

    print("KERNEL_OK")
</pallas_src>

<mosaic_0001>
module attributes {stable_mosaic.version = 11 : i64} {
  func.func @_multihead_kernel(%arg0: i32, %arg1: memref<2x32xf32, #tpu.memory_space<vmem>>, %arg2: memref<1x16x48xf32, #tpu.memory_space<vmem>>, %arg3: memref<1x32x32xf32, #tpu.memory_space<vmem>>, %arg4: memref<1x48x32xf32, #tpu.memory_space<vmem>>, %arg5: memref<1x32x128xf32, #tpu.memory_space<vmem>>, %arg6: memref<1x32x128xf32, #tpu.memory_space<vmem>>, %arg7: memref<1x2x16x128xf32, #tpu.memory_space<vmem>>) attributes {dimension_semantics = [#tpu.dimension_semantics<parallel>], iteration_bounds = array<i64: 2>, scalar_prefetch = 0 : i64, scratch_operands = 0 : i64, tpu.core_type = #tpu.core_type<tc>, window_params = [{pipeline_mode = #tpu.pipeline_mode<synchronous>, transform_indices = @transform_0, window_bounds = array<i64: 2, 32>}, {transform_indices = @transform_1, window_bounds = array<i64: 1, 16, 48>}, {transform_indices = @transform_2, window_bounds = array<i64: 1, 32, 32>}, {transform_indices = @transform_3, window_bounds = array<i64: 1, 48, 32>}, {transform_indices = @transform_4, window_bounds = array<i64: 1, 32, 128>}, {transform_indices = @transform_5, window_bounds = array<i64: 1, 32, 128>}, {transform_indices = @transform_6, window_bounds = array<i64: 1, 2, 16, 128>}]} {
    %c0 = arith.constant 0 : index
    %c0_0 = arith.constant 0 : index
    %0 = vector.load %arg1[%c0, %c0_0] : memref<2x32xf32, #tpu.memory_space<vmem>>, vector<2x32xf32>
    %c0_1 = arith.constant 0 : index
    %c0_2 = arith.constant 0 : index
    %c0_3 = arith.constant 0 : index
    %1 = vector.load %arg3[%c0_1, %c0_2, %c0_3] : memref<1x32x32xf32, #tpu.memory_space<vmem>>, vector<1x32x32xf32>
    %2 = vector.shape_cast %1 : vector<1x32x32xf32> to vector<32x32xf32>
    %cst = arith.constant dense<0.000000e+00> : vector<2x32xf32>
    %3 = tpu.matmul %0, %2, %cst {dimension_numbers = #tpu.dot_dimension_numbers<[1], [0], [0], [1], [0, 0, 1, 1], [], []>} : vector<2x32xf32>, vector<32x32xf32>, vector<2x32xf32> -> vector<2x32xf32>
    %cst_4 = arith.constant 0.000000e+00 : f32
    %4 = vector.broadcast %cst_4 : f32 to vector<2x32xf32>
    %5 = arith.maximumf %3, %4 : vector<2x32xf32>
    %c0_5 = arith.constant 0 : index
    %c0_6 = arith.constant 0 : index
    %c0_7 = arith.constant 0 : index
    %6 = vector.load %arg2[%c0_5, %c0_6, %c0_7] : memref<1x16x48xf32, #tpu.memory_space<vmem>>, vector<1x16x48xf32>
    %7 = vector.shape_cast %6 : vector<1x16x48xf32> to vector<16x48xf32>
    %c0_8 = arith.constant 0 : index
    %c0_9 = arith.constant 0 : index
    %c0_10 = arith.constant 0 : index
    %8 = vector.load %arg4[%c0_8, %c0_9, %c0_10] : memref<1x48x32xf32, #tpu.memory_space<vmem>>, vector<1x48x32xf32>
    %9 = vector.shape_cast %8 : vector<1x48x32xf32> to vector<48x32xf32>
    %cst_11 = arith.constant dense<0.000000e+00> : vector<16x32xf32>
    %10 = tpu.matmul %7, %9, %cst_11 {dimension_numbers = #tpu.dot_dimension_numbers<[1], [0], [0], [1], [0, 0, 1, 1], [], []>} : vector<16x48xf32>, vector<48x32xf32>, vector<16x32xf32> -> vector<16x32xf32>
    %cst_12 = arith.constant 0.000000e+00 : f32
    %11 = vector.broadcast %cst_12 : f32 to vector<16x32xf32>
    %12 = arith.maximumf %10, %11 : vector<16x32xf32>
    %c0_13 = arith.constant 0 : index
    %c0_14 = arith.constant 0 : index
    %c0_15 = arith.constant 0 : index
    %13 = vector.load %arg5[%c0_13, %c0_14, %c0_15] : memref<1x32x128xf32, #tpu.memory_space<vmem>>, vector<1x32x128xf32>
    %14 = vector.shape_cast %13 : vector<1x32x128xf32> to vector<32x128xf32>
    %cst_16 = arith.constant dense<0.000000e+00> : vector<2x128xf32>
    %15 = tpu.matmul %5, %14, %cst_16 {dimension_numbers = #tpu.dot_dimension_numbers<[1], [0], [0], [1], [0, 0, 1, 1], [], []>} : vector<2x32xf32>, vector<32x128xf32>, vector<2x128xf32> -> vector<2x128xf32>
    %c0_17 = arith.constant 0 : index
    %c0_18 = arith.constant 0 : index
    %c0_19 = arith.constant 0 : index
    %16 = vector.load %arg6[%c0_17, %c0_18, %c0_19] : memref<1x32x128xf32, #tpu.memory_space<vmem>>, vector<1x32x128xf32>
    %17 = vector.shape_cast %16 : vector<1x32x128xf32> to vector<32x128xf32>
    %cst_20 = arith.constant dense<0.000000e+00> : vector<16x128xf32>
    %18 = tpu.matmul %12, %17, %cst_20 {dimension_numbers = #tpu.dot_dimension_numbers<[1], [0], [0], [1], [0, 0, 1, 1], [], []>} : vector<16x32xf32>, vector<32x128xf32>, vector<16x128xf32> -> vector<16x128xf32>
    %19 = vector.shape_cast %15 : vector<2x128xf32> to vector<2x1x128xf32>
    %20 = vector.shape_cast %18 : vector<16x128xf32> to vector<1x16x128xf32>
    %21 = vector.broadcast %19 : vector<2x1x128xf32> to vector<2x16x128xf32>
    %22 = vector.broadcast %20 : vector<1x16x128xf32> to vector<2x16x128xf32>
    %23 = arith.addf %21, %22 : vector<2x16x128xf32>
    %c0_21 = arith.constant 0 : index
    %c0_22 = arith.constant 0 : index
    %c0_23 = arith.constant 0 : index
    %c0_24 = arith.constant 0 : index
    %24 = vector.load %arg7[%c0_21, %c0_22, %c0_23, %c0_24] : memref<1x2x16x128xf32, #tpu.memory_space<vmem>>, vector<1x2x16x128xf32>
    %25 = vector.shape_cast %24 : vector<1x2x16x128xf32> to vector<2x16x128xf32>
    %26 = vector.shape_cast %23 : vector<2x16x128xf32> to vector<1x2x16x128xf32>
    tpu.vector_store %arg7[%c0_21, %c0_22, %c0_23, %c0_24], %26 {strides = array<i32>} : memref<1x2x16x128xf32, #tpu.memory_space<vmem>>, vector<1x2x16x128xf32>,
    return
  }
  func.func @transform_0(%arg0: i32) -> (i32, i32) {
    %c0_i32 = arith.constant 0 : i32
    %c0_i32_0 = arith.constant 0 : i32
    %c0_i32_1 = arith.constant 0 : i32
    return %c0_i32, %c0_i32_0 : i32, i32
  }
  func.func @transform_1(%arg0: i32) -> (i32, i32, i32) {
    %c0_i32 = arith.constant 0 : i32
    %c0_i32_0 = arith.constant 0 : i32
    %c0_i32_1 = arith.constant 0 : i32
    return %arg0, %c0_i32, %c0_i32_0 : i32, i32, i32
  }
  func.func @transform_2(%arg0: i32) -> (i32, i32, i32) {
    %c0_i32 = arith.constant 0 : i32
    %c0_i32_0 = arith.constant 0 : i32
    %c0_i32_1 = arith.constant 0 : i32
    return %arg0, %c0_i32, %c0_i32_0 : i32, i32, i32
  }
  func.func @transform_3(%arg0: i32) -> (i32, i32, i32) {
    %c0_i32 = arith.constant 0 : i32
    %c0_i32_0 = arith.constant 0 : i32
    %c0_i32_1 = arith.constant 0 : i32
    return %arg0, %c0_i32, %c0_i32_0 : i32, i32, i32
  }
  func.func @transform_4(%arg0: i32) -> (i32, i32, i32) {
    %c0_i32 = arith.constant 0 : i32
    %c0_i32_0 = arith.constant 0 : i32
    %c0_i32_1 = arith.constant 0 : i32
    return %arg0, %c0_i32, %c0_i32_0 : i32, i32, i32
  }
  func.func @transform_5(%arg0: i32) -> (i32, i32, i32) {
    %c0_i32 = arith.constant 0 : i32
    %c0_i32_0 = arith.constant 0 : i32
    %c0_i32_1 = arith.constant 0 : i32
    return %arg0, %c0_i32, %c0_i32_0 : i32, i32, i32
  }
  func.func @transform_6(%arg0: i32) -> (i32, i32, i32, i32) {
    %c0_i32 = arith.constant 0 : i32
    %c0_i32_0 = arith.constant 0 : i32
    %c0_i32_1 = arith.constant 0 : i32
    %c0_i32_2 = arith.constant 0 : i32
    return %arg0, %c0_i32, %c0_i32_0, %c0_i32_1 : i32, i32, i32, i32
  }
}

</mosaic_0001>

<bundles_post_ra>
// kernel: tpu_custom_call.1
= control target key start
LH: loop header
LB: loop body
LE: loop exit
PB: predicated region body
PF: predicated region fallthrough
CT: control target
= control target key end

     0   :  { %s1505_s0 = inlined_call_operand.hbm [shape: f32[2,32], index: 0, kind: input, shape index: {}]   ;;  %s1506_s1 = inlined_call_operand.vmem [shape: f32[2,16,48], index: 1, kind: input, shape index: {}]   ;;  %s1507_s2 = inlined_call_operand.vmem [shape: f32[2,32,32], index: 2, kind: input, shape index: {}]   ;;  %s1508_s3 = inlined_call_operand.vmem [shape: f32[2,48,32], index: 3, kind: input, shape index: {}]   ;;  %s1509_s4 = inlined_call_operand.vmem [shape: f32[2,32,128], index: 4, kind: input, shape index: {}]   ;;  %s1510_s5 = inlined_call_operand.hbm [shape: f32[2,32,128], index: 5, kind: input, shape index: {}]   ;;  %s1511_s6 = inlined_call_operand.hbm [shape: f32[2,2,16,128], index: 6, kind: output, shape index: {}]  }
   0x1   :  { %1518 = sst [smem:[#allocation12_spill]] %s1505_s0 }
   0x2   :  { %1519 = sst [smem:[#allocation13_spill]] %s1510_s5 }
   0x3   :  { %11 = vsyncpa [#allocation3], 0 }
   0x4   :  { %12 = vsyncpa [#allocation6], 0 }
   0x5   :  { %14 = vsyncpa [#allocation6 + $0x1], 0 }
   0x6   :  { %15 = vsyncpa [#allocation4], 0 }
   0x7   :  { %17 = vsyncpa [#allocation4 + $0x1], 0  ;;  %s1265_s21 = smov 0   ;;  %s1267_s22 = smov 0  }
   0x8   :  { %s1269_s23 = smov 0   ;;  %s1271_s24 = smov 0  }
   0x9 LB: > { %s1286_s25 = sadd.s32 4294967295, %s1217_s24   ;;  %s885_s26 = sadd.s32 4294967294, %s1217_s24   ;;  %s1217_s24 = sphi %s1271_s24, %s1544_s24   ;;  %s1213_s23 = sphi %s1269_s23, %s1543_s23   ;;  %s1209_s22 = sphi %s1267_s22, %s1542_s22   ;;  %s1205_s21 = sphi %s1265_s21, %s1541_s21  }
   0xa   : > { %s1290_s27 = sadd.s32 1, %s1217_s24   ;;  %s155_s28 = sadd.s32 1, %s1213_s23 }
   0xb   : > { %s152_s29 = ssub.s32 %s1217_s24, %s1290_s27  ;;  %p162_p0 = scmp.ne.s32.totalorder %s1213_s23, %s1209_s22 }
   0xc   : > { %p153_p1 = scmp.eq.s32.totalorder %s152_s29, 0  ;;  %p163_p2 = scmp.eq.s32.totalorder %s1217_s24, 0 }
   0xd   : > { %p168_p3 = scmp.ne.s32.totalorder %s1209_s22, %s1205_s21  ;;  %p1512_p4 = scmp.eq.s32.totalorder %s1286_s25, 0 }
   0xe   : > { %s1302_s30 = scalar_select %p153_p1, %s1213_s23, %s155_s28  }
   0xf   : > { %p1304_p5 = por %p163_p2, %p162_p0  ;;  %p1310_p6 = por %p1512_p4, %p168_p3 }
  0x10   : > { %1520 = sst [smem:[#allocation11_spill]] %s1302_s30  ;;  %p192_p7 = scmp.eq.s32.totalorder %s1286_s25, 1 }
  0x11   : > { %s1522_s8 = scalar_select %p1310_p6, 1, 0 }
  0x12   : > { %p198_p8 = scmp.eq.s32.totalorder %s885_s26, 1  ;;  %p886_p9 = scmp.ge.s32.totalorder %s1217_s24, 1 }
  0x13   : > { %p205_p10 = scmp.lt.s32.totalorder %s1217_s24, 3  ;;  %p1317_p11 = por %p192_p7, %p162_p0 }
  0x14   : > { %p1321_p12 = por %p198_p8, %p168_p3  ;;  %s1219_s12 = smov [#allocation2]  }
  0x15   : > { %s1523_s9 = scalar_select %p1317_p11, 1, 0 }
  0x16   : > { %s1524_s10 = scalar_select %p1321_p12, 1, 0 }
  0x17   : > { %p1325_p13 = pnand %p886_p9, %p205_p10  ;;  %s218_s13 = sshll.u32 %s1219_s12, 4  ;;  %s219_s13 = int_to_ptr.vmem [resolvable:$true] %s218_s13 }
  0x18   : > { %p1045_p4 = scmp.lt.s32.totalorder %s1217_s24, 2  ;;  %p1526_p0 = scmp.eq.s32.totalorder %s1286_s25, 0 }
  0x19   : > { %s1525_s11 = scalar_select %p1325_p13, 1, 0 }
  0x1a   : > { %p1032_p2 = pneg %p1325_p13  ;;  %s261_s15 = sand.u32 1, %s1213_s23  }
  0x1b   : > { %p1342_p3 = pnand %p1045_p4, %p1304_p5  ;;  %s889_s17 = sshll.u32 %s261_s15, 5 }
  0x1c   : > { %p1335_p7 = pnand %p1032_p2, %p1526_p0  ;;  %s1529_s0 = sld [smem:[#allocation12_spill]] }
  0x1d   : > { %s1528_s16 = scalar_select %p1342_p3, 1, 0 }
  0x1e   : > { %p1091_p9 = pneg %p1335_p7 }
  0x22   : > { %s1089_s20 = scalar_lea.hbm %s1529_s0, 32 }
  0x23   : > { %p1090_p8 = scmp.ne.s32.totalorder %s1529_s0, %s1089_s20  ;;  %p1096_p4 = scmp.lt.u32.totalorder %s1089_s20, %s1529_s0 }
  0x25   : > { %p1092_p10 = pnand %p1091_p9, %p1090_p8 }
  0x27   : > { %p1093_p2 = pneg %p1092_p10 }
  0x29   : > { %p1098_p5 = pnand %p1096_p4, %p1093_p2 }
  0x2b   : > { %1101 = shalt.err (!%p1098_p5)
}
  0x2c   : > { %s1102_s7 = scalar_lea.vmem %s219_s13, 32  ;;  %p1110_p11 = scmp.lt.s32.totalorder %s219_s13, %s219_s13 }
  0x2d   : > { %p1103_p0 = scmp.ne.s32.totalorder %s219_s13, %s1102_s7  ;;  %p1111_p6 = scmp.lt.s32.totalorder %s1102_s7, %s1102_s7 }
  0x2f   : > { %p1105_p1 = pnand %p1103_p0, %p1091_p9  ;;  %p1112_p13 = por %p1111_p6, %p1110_p11 }
  0x31   : > { %p1106_p12 = pneg %p1105_p1 }
  0x33   : > { %p1113_p3 = pnand %p1112_p13, %p1106_p12 }
  0x35   : > { %1116 = shalt.err (!%p1113_p3)
}
  0x36   : > { %1035 = dma.hbm_to_vmem [thread:$0]  (!%p1335_p7), %s1529_s0, 32, %s219_s13, [#allocation3]  }
  0x37   : > { %s914_s20 = sshll.u32 %s1217_s24, 9  ;;  %s265_s26 = scalar_lea.vmem [#allocation5], %s889_s17 }
  0x38   : > { %s272_s28 = sshll.u32 %s265_s26, 4  ;;  %s1530_s5 = sld [smem:[#allocation13_spill]]  ;;  %s1368_s28 = int_to_ptr.vmem [resolvable:$true] %s272_s28 }
  0x39   : > { %s1370_s14 = scalar_lea.sflag [#allocation6], %s261_s15  ;;  %p1531_p11 = scmp.ne.s32.totalorder %s1528_s16, 0 }
  0x3b   : > { %p1119_p12 = pneg %p1531_p11 }
  0x3e   : > { %s1366_s30 = scalar_lea.hbm %s1530_s5, %s914_s20  ;;  %s1122_s18 = scalar_lea.hbm %s1530_s5, 1024 }
  0x3f   : > { %s1117_s7 = scalar_lea.hbm %s1366_s30, 512  ;;  %p1123_p7 = scmp.lt.u32.totalorder %s1366_s30, %s1530_s5 }
  0x40   : > { %p1118_p6 = scmp.ne.s32.totalorder %s1366_s30, %s1117_s7  ;;  %p1124_p3 = scmp.lt.u32.totalorder %s1122_s18, %s1117_s7 }
  0x41   : > { %p1126_p9 = scmp.lt.u32.totalorder %s1117_s7, %s1366_s30 }
  0x42   : > { %p1120_p13 = pnand %p1119_p12, %p1118_p6  ;;  %p1125_p8 = por %p1124_p3, %p1123_p7 }
  0x44   : > { %p1121_p1 = pneg %p1120_p13  ;;  %p1127_p10 = por %p1126_p9, %p1125_p8 }
  0x46   : > { %p1128_p2 = pnand %p1127_p10, %p1121_p1 }
  0x48   : > { %1131 = shalt.err (!%p1128_p2)
}
  0x49   : > { %s1132_s15 = scalar_lea.vmem %s1368_s28, 512  ;;  %s1220_s26 = smov [#allocation5]  }
  0x4a   : > { %p1133_p4 = scmp.ne.s32.totalorder %s1368_s28, %s1132_s15  ;;  %s1137_s29 = sshll.u32 %s1220_s26, 4  ;;  %s1138_s29 = int_to_ptr.vmem [resolvable:$false] %s1137_s29 }
  0x4b   : > { %s1139_s12 = scalar_lea.vmem %s1138_s29, 1024  ;;  %p1140_p6 = scmp.lt.s32.totalorder %s1368_s28, %s1138_s29 }
  0x4c   : > { %p1135_p5 = pnand %p1133_p4, %p1119_p12  ;;  %p1141_p13 = scmp.lt.s32.totalorder %s1139_s12, %s1132_s15 }
  0x4e   : > { %p1136_p0 = pneg %p1135_p5  ;;  %p1142_p7 = por %p1141_p13, %p1140_p6 }
  0x50   : > { %p1143_p3 = pnand %p1142_p7, %p1136_p0 }
  0x52   : > { %1146 = shalt.err (!%p1143_p3)
}
  0x53   : > { %s1221_s7 = smov 128   ;;  %s1222_s13 = smov 8  }
  0x54   : > { %1039 = dma.hbm_to_vmem [thread:$0]  (!%p1531_p11), %s1366_s30, 512, %s1368_s28, %s1370_s14, %s1221_s7, %s1221_s7, %s1222_s13  }
  0x55   : > { %p1532_p12 = scmp.ne.s32.totalorder %s1525_s11, 0 }
  0x56   : > { %p1533_p1 = scmp.eq.s32.totalorder (!%p1532_p12), %s1286_s25, 0 }
  0x57   : > { %284 = sbr.rel (%p1532_p12) target bundleno = 567 (0x237), region = 44 }
  0x5e   : > { %1192 = dma.done.wait (%p1533_p1), [#allocation3], 32   ;;  %p1534_p8 = pmov %p1533_p1 }
  0x5f   : > { %s1405_s17 = sand.u32 1, %s1209_s22   ;;  %p1535_p11 = scmp.ne.s32.totalorder %s1522_s8, 0 }
  0x60   : > { %1194 = vsyncadd (%p1534_p8), [#allocation3], 4294967264  ;;  %s1517_s18 = sshll.u32 %s1405_s17, 5  ;;  %s291_s19 = scalar_lea.sflag [#allocation6], %s1405_s17 }
  0x61   : > { %s1411_s30 = scalar_lea.vmem [#allocation5], %s1517_s18 }
  0x62   : > { %1196 = dma.done.wait (%p1535_p11), %s291_s19, 512  }
  0x63   : > { %1198 = vsyncadd (%p1535_p11), %s291_s19, 4294966784  ;;  %p343_p9 = scmp.lt.s32.totalorder %s1286_s25, 1  ;;  %v1223_v0 = vmov 0.0|0.0   ;;  %vm1224_vm0 = vmmov 0   ;;  %v1225_v1 = vmov 0.0   ;;  %vm451_vm1 = vcmask 392192  }
  0x64   : > { %991 = vmatprep.subr.bf16.mxu0 %v1223_v0  ;;  %951 = vmatprep.mubr.msk.f32.mxu0 %vm1224_vm0, %v1225_v1  ;;  %v363_v20 = vld [vmem:[#allocation2] sm:$0x3]  ;;  %vm368_vm2 = vcmask 261120   ;;  %v612_v26 = vld [vmem:[%s1411_s30] sm:$0xff]  ;;  %v613_v27 = vld [vmem:[%s1411_s30 + $0x8] sm:$0xff]  ;;  %v701_v41 = vlaneseq  ;;  %s1536_s0 = sshll.u32 %s1405_s17, 5 }
  0x65   : > { %s344_s11 = scalar_select %p343_p9, %s1286_s25, 1  ;;  %v1015_v28 = vpack.c.bf16 %v613_v27, %v612_v26  ;;  %v614_v29 = vld [vmem:[%s1411_s30 + $0x10] sm:$0xff]  ;;  %v615_v30 = vld [vmem:[%s1411_s30 + $0x18] sm:$0xff]  ;;  %v1226_v39 = vmov 1966171168  }
  0x66   : > { %v1019_v31 = vpack.c.bf16 %v615_v30, %v614_v29  ;;  %v699_v40 = vunpack.c.l.s4 %v1226_v39  ;;  %v702_v43 = vshrl.u32 %v701_v41, 7  ;;  %s918_s30 = sshll.u32 %s1286_s25, 9  ;;  %s739_s25 = scalar_lea.sflag [#allocation4], %s1405_s17 }
  0x67   : > { %s916_s16 = sshll.u32 %s344_s11, 5  ;;  %s1023_s28 = smul.u32 48, %s344_s11 }
  0x68   : > { %s352_s15 = scalar_lea.vmem %s1507_s2, %s916_s16  ;;  %s915_s12 = sshll.u32 %s344_s11, 4  ;;  %v700_v42 = vunpack.c.0.s8 %v699_v40  ;;  %v722_v48 = vsub.s32 0, %v702_v43 }
  0x69   : > { %s357_s8 = scalar_lea.vmem %s1508_s3, %s1023_s28  ;;  %v364_v2 = vld [vmem:[%s352_s15] sm:$0xff]  ;;  %v365_v3 = vld [vmem:[%s352_s15 + $0x8] sm:$0xff]  ;;  %s1429_s19 = scalar_lea.vmem %s1506_s1, %s915_s12  ;;  %v366_v7 = vld [vmem:[%s352_s15 + $0x10] sm:$0xff] }
  0x6a   : > { %v445_v4 = vld [vmem:[%s357_s8] sm:$0xff]  ;;  %s1434_s5 = scalar_lea.vmem %s1509_s4, %s916_s16  ;;  %v992_v5 = vpack.c.bf16 %v365_v3, %v364_v2  ;;  %v446_v6 = vld [vmem:[%s357_s8 + $0x8] sm:$0xff]  ;;  %v367_v8 = vld [vmem:[%s352_s15 + $0x18] sm:$0xff]  ;;  %v703_v44 = vsub.s32 %v700_v42, %v702_v43  ;;  %s1461_s28 = scalar_lea.hbm %s1511_s6, %s918_s30 }
  0x6b   : > { %v997_v9 = vpack.c.bf16 %v446_v6, %v445_v4  ;;  %v447_v10 = vld [vmem:[%s357_s8 + $0x10] sm:$0xff]  ;;  %v448_v11 = vld [vmem:[%s357_s8 + $0x18] sm:$0xff]  ;;  %v995_v12 = vpack.c.bf16 %v367_v8, %v366_v7  ;;  %v449_v14 = vld [vmem:[%s357_s8 + $0x20] sm:$0xff]  ;;  %p1537_p2 = scmp.ne.s32.totalorder %s1523_s9, 0  ;;  %s1227_s20 = smov [#allocation7]  }
  0x6c   : > { %993 = vmatpush3.bf16.msra.mxu0 %v992_v5  ;;  %v1001_v13 = vpack.c.bf16 %v448_v11, %v447_v10  ;;  %v450_v15 = vld [vmem:[%s357_s8 + $0x28] sm:$0xff]  ;;  %v443_v16 = vld [vmem:[%s1429_s19] sm:$0xff]  ;;  %v537_v23 = vld [vmem:[%s1434_s5 + $0x10] sm:$0xff]  ;;  %s1151_s15 = sshll.u32 %s1227_s20, 4  ;;  %s1152_s15 = int_to_ptr.vmem [resolvable:$false] %s1151_s15 }
  0x6d   : > { %998 = vmatprep.subr.bf16.mxu1 %v997_v9  ;;  %994 = vmatprep.subr.bf16.mxu0 %v1223_v0  ;;  %v535_v17 = vld [vmem:[%s1434_s5] sm:$0xff]  ;;  %v536_v18 = vld [vmem:[%s1434_s5 + $0x8] sm:$0xff]  ;;  %v1005_v19 = vpack.c.bf16 %v450_v15, %v449_v14  ;;  %v538_v24 = vld [vmem:[%s1434_s5 + $0x18] sm:$0xff]  ;;  %s342_s5 = scalar_lea.vmem [#allocation7], %s1536_s0  ;;  %s1153_s26 = scalar_lea.vmem %s1152_s15, 1024 }
  0x6e   : > { %1000 = vmatpush3.bf16.msra.mxu1 %v997_v9  ;;  %966 = vmatprep.mubr.msk.f32.mxu1 %vm451_vm1, %v443_v16  ;;  %v1010_v21 = vpack.c.bf16 %v536_v18, %v535_v17  ;;  %v444_v22 = vld [vmem:[%s1429_s19 + $0x8] sm:$0xff]  ;;  %v1013_v25 = vpack.c.bf16 %v538_v24, %v537_v23  ;;  %s752_s18 = sshll.u32 %s342_s5, 4  ;;  %s1456_s18 = int_to_ptr.vmem [resolvable:$true] %s752_s18 }
  0x6f   : > { %1002 = vmatprep.subr.bf16.mxu1 %v1001_v13  ;;  %s1147_s14 = scalar_lea.vmem %s1456_s18, 512  ;;  %p1154_p0 = scmp.lt.s32.totalorder %s1456_s18, %s1152_s15 }
  0x70   : > { %996 = vmatpush3.bf16.msra.mxu0 %v995_v12  ;;  %p1148_p10 = scmp.ne.s32.totalorder %s1456_s18, %s1147_s14  ;;  %p1155_p6 = scmp.lt.s32.totalorder %s1153_s26, %s1147_s14 }
  0x71   : > { %1009 = vmatprep.subr.bf16.mxu0 %v1223_v0 }
  0x72   : > { %1004 = vmatpush3.bf16.msra.mxu1 %v1001_v13  ;;  %p1149_p4 = pnand %p1148_p10, %p1537_p2  ;;  %p1156_p13 = por %p1155_p6, %p1154_p0 }
  0x73   : > { %952 = vmatmul.mubr.msk.f32.vlgmr.msra.gmra.mrb[0].mxu0 %vm368_vm2, %v363_v20  ;;  %1006 = vmatprep.subr.bf16.mxu1 %v1005_v19 }
  0x74   : > { %1011 = vmatpush3.bf16.msra.mxu0 %v1010_v21  ;;  %977 = vmatprep.mubr.msk.f32.mxu0 %vm1224_vm0, %v1225_v1  ;;  %p1150_p5 = pneg %p1149_p4 }
  0x75   : > { %1012 = vmatprep.subr.bf16.mxu0 %v1223_v0 }
  0x76   : > { %1008 = vmatpush3.bf16.msra.mxu1 %v1005_v19  ;;  %p1157_p7 = pnand %p1156_p13, %p1150_p5 }
  0x77   : > { %1016 = vmatprep.subr.bf16.mxu1 %v1015_v28 }
  0x78   : > { %1014 = vmatpush3.bf16.msra.mxu0 %v1013_v25 }
  0x79   : > { %967 = vmatmul.mubr.msk.f32.vlgmr.msra.gmra.mrb[0].mxu1 %vm451_vm1, %v444_v22 }
  0x7a   : > { %1018 = vmatpush3.bf16.msra.mxu1 %v1015_v28 }
  0x7b   : > { %1020 = vmatprep.subr.bf16.mxu1 %v1019_v31 }
  0x7e   : > { %1022 = vmatpush3.bf16.msra.mxu1 %v1019_v31 }
 0x146   : > { %v438_v32 = vpop.f32.mrb[0].mxu0 }
 0x147   : > { %v442_v33 = vmax.f32 %v438_v32, 0.0  ;;  %v953_v34 = vpop.f32.mrb[1].mxu0 }
 0x149   : > { %978 = vmatmul.mubr.msk.f32.vlgmr.msra.gmra.mrb[2].mxu0 %vm368_vm2, %v442_v33 }
 0x14c   : > { %v968_v35 = vpop.f32.mrb[0].mxu1 }
 0x14d   : > { %v524_v36 = vpop.f32.mrb[1].mxu1  ;;  %v534_v38 = vmax.f32 %v968_v35, 0.0 }
 0x14e   : > { %v533_v37 = vmax.f32 %v524_v36, 0.0 }
 0x150   : > { %988 = vmatprep.mubr.msk.f32.mxu1 %vm368_vm2, %v533_v37 }
 0x151   : > { %989 = vmatmul.mubr.msk.f32.vlgmr.msra.gmra.mrb[2].mxu1 %vm368_vm2, %v534_v38 }
 0x21c   : > { %v608_v45 = vpop.f32.mrb[2].mxu0 }
 0x21d   : > { %v704_v46 = vrot.slane %v608_v45, %v703_v44  ;;  %v979_v47 = vpop.f32.mrb[3].mxu0 }
 0x21f   : > { %v705_v49 = vcombine.high %v704_v46, %v704_v46  ;;  %v712_v50 = vrot.slane %v704_v46, %v703_v44 }
 0x221   : > { %v719_v51 = vrot.slane %v705_v49, %v703_v44  ;;  %v723_v52 = vrot.slane %v712_v50, %v722_v48 }
 0x223   : > { %v727_v53 = vrot.slane %v719_v51, %v722_v48 }
 0x224   : > { %v990_v54 = vpop.f32.mrb[2].mxu1 }
 0x225   : > { %v731_v55 = vadd.f32 %v990_v54, %v723_v52  ;;  %v733_v56 = vadd.f32 %v990_v54, %v727_v53  ;;  %v688_v57 = vpop.f32.mrb[3].mxu1 }
 0x226   : > { %v730_v58 = vadd.f32 %v723_v52, %v688_v57  ;;  %v732_v59 = vadd.f32 %v727_v53, %v688_v57 }
 0x227   : > { %735 = vst [vmem:[%s342_s5 + $0x8] sm:$0xff] %v731_v55  ;;  %737 = vst [vmem:[%s342_s5 + $0x18] sm:$0xff] %v733_v56 }
 0x228   : > { %734 = vst [vmem:[%s342_s5] sm:$0xff] %v730_v58  ;;  %736 = vst [vmem:[%s342_s5 + $0x10] sm:$0xff] %v732_v59 }
 0x229   : > { %1160 = shalt.err (!%p1157_p7)
}
 0x22a   : > { %s1161_s29 = scalar_lea.hbm %s1461_s28, 512  ;;  %s1165_s7 = scalar_lea.hbm %s1511_s6, 1024 }
 0x22b   : > { %p1162_p3 = scmp.ne.s32.totalorder %s1461_s28, %s1161_s29  ;;  %p1166_p8 = scmp.lt.u32.totalorder %s1461_s28, %s1511_s6 }
 0x22c   : > { %p1167_p11 = scmp.lt.u32.totalorder %s1165_s7, %s1161_s29  ;;  %p1169_p10 = scmp.lt.u32.totalorder %s1161_s29, %s1461_s28 }
 0x22d   : > { %p1163_p12 = pnand %p1162_p3, %p1537_p2 }
 0x22e   : > { %p1168_p9 = por %p1167_p11, %p1166_p8 }
 0x22f   : > { %p1164_p1 = pneg %p1163_p12 }
 0x230   : > { %p1170_p4 = por %p1169_p10, %p1168_p9 }
 0x232   : > { %p1171_p5 = pnand %p1170_p4, %p1164_p1 }
 0x234   : > { %1174 = shalt.err (!%p1171_p5)
}
 0x235   : > { %s1228_s0 = smov 128   ;;  %s1229_s5 = smov 8  }
 0x236   : > { %1030 = dma.vmem_to_hbm [thread:$0]  (%p1537_p2), %s1456_s18, 512, %s1461_s28, %s739_s25, %s1228_s0, %s1228_s0, %s1229_s5  }
 0x237 PF: > { %s767_s30 = sand.u32 1, %s1205_s21   ;;  %p1538_p0 = scmp.ne.s32.totalorder %s1524_s10, 0 }
 0x238   : > { %p1539_p6 = scmp.ge.s32.totalorder %s1217_s24, 2  ;;  %s768_s11 = scalar_lea.sflag [#allocation4], %s767_s30 }
 0x23a   : > { %p1041_p13 = pnand %p1539_p6, %p1538_p0 }
 0x23c   : > { %1200 = dma.done.wait (!%p1041_p13), %s768_s11, 512  }
 0x23d   : > { %1202 = vsyncadd (!%p1041_p13), %s768_s11, 4294966784  ;;  %s1540_s16 = sld [smem:[#allocation11_spill]]  ;;  %p20_p7 = scmp.ge.s32.totalorder %s1290_s27, 4  }
 0x23e   : > { %s1541_s21 = smov %s1209_s22  ;;  %s1542_s22 = smov %s1213_s23 }
 0x23f   : > { %s1544_s24 = smov %s1290_s27  ;;  %22 = sbr.rel (!%p20_p7) target bundleno = 9 (0x9), region = 106 }
 0x243   : > { %s1543_s23 = smov %s1540_s16 }
 0x246   :  { %773 = vsyncpa [#allocation3], 1 }
 0x247   :  { %775 = vsyncpa [#allocation3 + $0x1], 1 }
 0x248   :  { %776 = vsyncpa [#allocation6], 1 }
 0x249   :  { %778 = vsyncpa [#allocation6 + $0x1], 1 }
 0x24a   :  { %779 = vsyncpa [#allocation4], 1 }
 0x24b   :  { %781 = vsyncpa [#allocation4 + $0x1], 1 }

</bundles_post_ra>
